<compile_context>
chip_gen: v5e
topology: v5e:2x2
jax: 0.10.0
libtpu: 0.0.40
codegen_flags: <defaults>
</compile_context>

<pallas_src>
import math

import jax
import jax.numpy as jnp
from jax.experimental import pallas as pl
from jax.experimental.pallas import tpu as pltpu


# --------------------------------------------------------------------------
# Hardware-aware defaults
# --------------------------------------------------------------------------

def _default_block_k():
    """kv tile: 256 fills the 256-deep MXU on v6e/v7x; keep 128 on v5e/v5p."""
    try:
        kind = jax.devices()[0].device_kind.lower()
    except Exception:
        return 256
    return 128 if "v5" in kind else 256


def _vmem_limit_bytes():
    """Scoped-VMEM budget with ~25% headroom; also fits v7x's 64 MiB per-TC."""
    try:
        cap = pltpu.get_tpu_info().vmem_capacity_bytes
        return min(int(cap * 3 // 4), 96 * 1024 * 1024)
    except Exception:
        return 48 * 1024 * 1024


# --------------------------------------------------------------------------
# Pass 1: per-tensor head projection  x @ W + b -> (B, H, S, d_k) bf16
# --------------------------------------------------------------------------

def make_proj_kernel(H, d_k, ts):
    def proj_kernel(x_ref, w_ref, b_ref, o_ref):
        x = x_ref[0].astype(jnp.bfloat16)                              # (ts, D)
        y = jnp.dot(x, w_ref[...],
                    preferred_element_type=jnp.float32) + b_ref[...]   # (ts, D)
        # Head split + transpose ONCE per projected tile (hoisted out of the
        # attention kv loop), emitting the head-leading bf16 layout the
        # attention kernel consumes directly.
        yh = jnp.transpose(y.reshape(ts, H, d_k), (1, 0, 2))           # (H, ts, d_k)
        o_ref[0] = yh.astype(jnp.bfloat16)

    return proj_kernel


def _project_heads(x, w, b, num_heads, *, tile, vmem_limit):
    B, S, D = x.shape
    d_k = D // num_heads
    ts = min(tile, S)
    assert S % ts == 0, "seq length must divide the projection tile size"

    kernel = make_proj_kernel(num_heads, d_k, ts)
    grid_spec = pltpu.PrefetchScalarGridSpec(
        num_scalar_prefetch=0,
        grid=(B, S // ts),
        in_specs=[
            pl.BlockSpec((1, ts, D), lambda bi, t: (bi, t, 0)),   # activations
            pl.BlockSpec((D, D), lambda bi, t: (0, 0)),           # W (constant)
            pl.BlockSpec((1, D), lambda bi, t: (0, 0)),           # bias (constant)
        ],
        out_specs=pl.BlockSpec((1, num_heads, ts, d_k),
                               lambda bi, t: (bi, 0, t, 0)),
    )
    return pl.pallas_call(
        kernel,
        out_shape=jax.ShapeDtypeStruct((B, num_heads, S, d_k), jnp.bfloat16),
        grid_spec=grid_spec,
        compiler_params=pltpu.CompilerParams(
            dimension_semantics=("parallel", "parallel"),
            vmem_limit_bytes=vmem_limit,
        ),
    )(x, w, b)


# --------------------------------------------------------------------------
# Pass 2: flash attention over pre-projected heads + output projection
# --------------------------------------------------------------------------

def make_attn_kernel(H, d_k, tq, D):
    def attn_kernel(q_ref, k_ref, v_ref, wo_ref, bo_ref, o_ref,
                    m_s, l_s, acc_s):
        ki = pl.program_id(2)

        @pl.when(ki == 0)
        def _init():
            m_s[...] = jnp.full((H, tq, 1), -jnp.inf, jnp.float32)
            l_s[...] = jnp.zeros((H, tq, 1), jnp.float32)
            acc_s[...] = jnp.zeros((H, tq, d_k), jnp.float32)

        q = q_ref[0]          # (H, tq, d_k) bf16, pre-scaled by 1/sqrt(d_k)
        k = k_ref[0]          # (H, tk, d_k) bf16
        v = v_ref[0]          # (H, tk, d_k) bf16

        # Per-head scores; contraction on the last dims (no .T feeding the MXU).
        s = jnp.einsum("hqd,hkd->hqk", q, k,
                       preferred_element_type=jnp.float32)             # (H, tq, tk)

        # Online (flash-style) softmax update in f32.
        m_prev = m_s[...]
        m_new = jnp.maximum(m_prev, jnp.max(s, axis=-1, keepdims=True))
        alpha = jnp.exp(m_prev - m_new)
        p = jnp.exp(s - m_new)
        l_s[...] = alpha * l_s[...] + jnp.sum(p, axis=-1, keepdims=True)
        acc_s[...] = alpha * acc_s[...] + jnp.einsum(
            "hqk,hkd->hqd", p.astype(jnp.bfloat16), v,
            preferred_element_type=jnp.float32)
        m_s[...] = m_new

        @pl.when(ki == pl.num_programs(2) - 1)
        def _finalize():
            # Exact reciprocal (one EUP op per q-tile) for parity with the module.
            ctx = acc_s[...] * pl.reciprocal(l_s[...], approx=False)   # (H, tq, d_k)
            # Combine heads once per q-tile (outside the kv loop) and project.
            ctx = jnp.transpose(ctx, (1, 0, 2)).reshape(tq, D)
            out = jnp.dot(ctx.astype(jnp.bfloat16), wo_ref[...],
                          preferred_element_type=jnp.float32) + bo_ref[...]
            o_ref[0] = out.astype(o_ref.dtype)

    return attn_kernel


def multi_head_attention(Q, K, V, params, num_heads, *,
                         block_q=128, block_k=None, block_proj=None):
    """Pallas MHA forward. Q: (B, Sq, D), K/V: (B, Skv, D) float32. mask unsupported."""
    B, Sq, D = Q.shape
    Bk, Skv, Dk = K.shape
    assert V.shape == K.shape and Bk == B and Dk == D
    assert D % num_heads == 0, "d_model must be divisible by num_heads"
    d_k = D // num_heads
    scale = 1.0 / math.sqrt(d_k)

    default_blk = _default_block_k()
    tq = min(block_q, Sq)
    tk = min(block_k if block_k is not None else default_blk, Skv)
    tp = block_proj if block_proj is not None else default_blk
    assert Sq % tq == 0 and Skv % tk == 0, "seq lengths must divide tile sizes"
    nq, nk = Sq // tq, Skv // tk

    vmem_limit = _vmem_limit_bytes()

    # Host-side (free) weight prep: bf16 MXU weights, 1/sqrt(d_k) folded into Q.
    wq = (params["wq"] * scale).astype(jnp.bfloat16)
    bq = (params["bq"] * scale).astype(jnp.float32)
    wk = params["wk"].astype(jnp.bfloat16)
    bk = params["bk"].astype(jnp.float32)
    wv = params["wv"].astype(jnp.bfloat16)
    bv = params["bv"].astype(jnp.float32)
    wo = params["wo"].astype(jnp.bfloat16)
    bo = params["bo"].astype(jnp.float32)

    # Pass 1: project each tensor exactly once into head-leading bf16 layout.
    qh = _project_heads(Q, wq, bq, num_heads, tile=tp, vmem_limit=vmem_limit)
    kh = _project_heads(K, wk, bk, num_heads, tile=tp, vmem_limit=vmem_limit)
    vh = _project_heads(V, wv, bv, num_heads, tile=tp, vmem_limit=vmem_limit)

    # Pass 2: flash attention over the pre-projected tiles.
    kernel = make_attn_kernel(num_heads, d_k, tq, D)
    grid_spec = pltpu.PrefetchScalarGridSpec(
        num_scalar_prefetch=0,
        grid=(B, nq, nk),
        in_specs=[
            pl.BlockSpec((1, num_heads, tq, d_k), lambda b, qi, ki: (b, 0, qi, 0)),
            pl.BlockSpec((1, num_heads, tk, d_k), lambda b, qi, ki: (b, 0, ki, 0)),
            pl.BlockSpec((1, num_heads, tk, d_k), lambda b, qi, ki: (b, 0, ki, 0)),
            pl.BlockSpec((D, D), lambda b, qi, ki: (0, 0)),      # Wo (constant)
            pl.BlockSpec((1, D), lambda b, qi, ki: (0, 0)),      # bo (constant)
        ],
        out_specs=pl.BlockSpec((1, tq, D), lambda b, qi, ki: (b, qi, 0)),
        scratch_shapes=[
            pltpu.VMEM((num_heads, tq, 1), jnp.float32),     # running max m
            pltpu.VMEM((num_heads, tq, 1), jnp.float32),     # running sum l
            pltpu.VMEM((num_heads, tq, d_k), jnp.float32),   # output accumulator
        ],
    )

    return pl.pallas_call(
        kernel,
        out_shape=jax.ShapeDtypeStruct((B, Sq, D), Q.dtype),
        grid_spec=grid_spec,
        compiler_params=pltpu.CompilerParams(
            dimension_semantics=("parallel", "parallel", "arbitrary"),
            vmem_limit_bytes=vmem_limit,
        ),
    )(qh, kh, vh, wo, bo)


# --------------------------------------------------------------------------
# Pure-JAX f32 reference replicating the PyTorch module semantics
# --------------------------------------------------------------------------

def reference_mha(Q, K, V, params, num_heads):
    B, S, D = Q.shape
    d_k = D // num_heads

    def lin(x, w, b):
        return x @ w + b[0]

    def split(x):  # (B,S,D) -> (B,H,S,d_k)
        b, s, _ = x.shape
        return x.reshape(b, s, num_heads, d_k).transpose(0, 2, 1, 3)

    q = split(lin(Q, params["wq"], params["bq"]))
    k = split(lin(K, params["wk"], params["bk"]))
    v = split(lin(V, params["wv"], params["bv"]))
    scores = jnp.einsum("bhqd,bhkd->bhqk", q, k) / math.sqrt(d_k)
    probs = jax.nn.softmax(scores, axis=-1)
    ctx = jnp.einsum("bhqk,bhkd->bhqd", probs, v)
    ctx = ctx.transpose(0, 2, 1, 3).reshape(B, S, D)
    return lin(ctx, params["wo"], params["bo"])


def init_params(key, d_model):
    """Deterministic nn.Linear-style init: U(-1/sqrt(d), 1/sqrt(d))."""
    bound = 1.0 / math.sqrt(d_model)
    keys = jax.random.split(key, 8)

    def u(k, shape):
        return jax.random.uniform(k, shape, jnp.float32, -bound, bound)

    return {
        "wq": u(keys[0], (d_model, d_model)), "bq": u(keys[1], (1, d_model)),
        "wk": u(keys[2], (d_model, d_model)), "bk": u(keys[3], (1, d_model)),
        "wv": u(keys[4], (d_model, d_model)), "bv": u(keys[5], (1, d_model)),
        "wo": u(keys[6], (d_model, d_model)), "bo": u(keys[7], (1, d_model)),
    }


if __name__ == "__main__":
    B, S, D, H = 2, 8, 32, 4  # batch, seq, d_model, num_heads (small smoke test)

    key = jax.random.PRNGKey(0)
    kq, kk, kv, kp = jax.random.split(key, 4)
    Q = jax.random.normal(kq, (B, S, D), jnp.float32)
    K = jax.random.normal(kk, (B, S, D), jnp.float32)
    V = jax.random.normal(kv, (B, S, D), jnp.float32)
    params = init_params(kp, D)

    out = multi_head_attention(Q, K, V, params, H)
    out = jax.block_until_ready(out)

    ref = reference_mha(Q, K, V, params, H)
    assert out.shape == (B, S, D)
    err = jnp.max(jnp.abs(out - ref))
    # bf16 MXU inputs -> looser tolerance than the pure-f32 reference.
    assert jnp.allclose(out, ref, atol=5e-2, rtol=5e-2), f"max err {err}"

    print("KERNEL_OK")
</pallas_src>

<mosaic_0001>
module attributes {stable_mosaic.version = 11 : i64} {
  func.func @proj_kernel(%arg0: i32, %arg1: i32, %arg2: memref<1x8x32xf32, #tpu.memory_space<vmem>>, %arg3: memref<32x32xbf16, #tpu.memory_space<vmem>>, %arg4: memref<1x32xf32, #tpu.memory_space<vmem>>, %arg5: memref<1x4x8x8xbf16, #tpu.memory_space<vmem>>) attributes {dimension_semantics = [#tpu.dimension_semantics<parallel>, #tpu.dimension_semantics<parallel>], iteration_bounds = array<i64: 2, 1>, scalar_prefetch = 0 : i64, scratch_operands = 0 : i64, tpu.core_type = #tpu.core_type<tc>, window_params = [{transform_indices = @transform_0, window_bounds = array<i64: 1, 8, 32>}, {pipeline_mode = #tpu.pipeline_mode<synchronous>, transform_indices = @transform_1, window_bounds = array<i64: 32, 32>}, {pipeline_mode = #tpu.pipeline_mode<synchronous>, transform_indices = @transform_2, window_bounds = array<i64: 1, 32>}, {transform_indices = @transform_3, window_bounds = array<i64: 1, 4, 8, 8>}]} {
    %c0 = arith.constant 0 : index
    %c0_0 = arith.constant 0 : index
    %c0_1 = arith.constant 0 : index
    %0 = vector.load %arg2[%c0, %c0_0, %c0_1] : memref<1x8x32xf32, #tpu.memory_space<vmem>>, vector<1x8x32xf32>
    %1 = vector.shape_cast %0 : vector<1x8x32xf32> to vector<8x32xf32>
    %2 = arith.truncf %1 : vector<8x32xf32> to vector<8x32xbf16>
    %c0_2 = arith.constant 0 : index
    %c0_3 = arith.constant 0 : index
    %3 = vector.load %arg3[%c0_2, %c0_3] : memref<32x32xbf16, #tpu.memory_space<vmem>>, vector<32x32xbf16>
    %cst = arith.constant dense<0.000000e+00> : vector<8x32xf32>
    %4 = tpu.matmul %2, %3, %cst {dimension_numbers = #tpu.dot_dimension_numbers<[1], [0], [0], [1], [0, 0, 1, 1], [], []>} : vector<8x32xbf16>, vector<32x32xbf16>, vector<8x32xf32> -> vector<8x32xf32>
    %c0_4 = arith.constant 0 : index
    %c0_5 = arith.constant 0 : index
    %5 = vector.load %arg4[%c0_4, %c0_5] : memref<1x32xf32, #tpu.memory_space<vmem>>, vector<1x32xf32>
    %6 = vector.broadcast %5 : vector<1x32xf32> to vector<8x32xf32>
    %7 = arith.addf %4, %6 : vector<8x32xf32>
    %8 = vector.shape_cast %7 : vector<8x32xf32> to vector<8x4x8xf32>
    %9 = tpu.transpose %8, [1, 0, 2] : vector<8x4x8xf32> -> vector<4x8x8xf32>
    %10 = arith.truncf %9 : vector<4x8x8xf32> to vector<4x8x8xbf16>
    %c0_6 = arith.constant 0 : index
    %c0_7 = arith.constant 0 : index
    %c0_8 = arith.constant 0 : index
    %c0_9 = arith.constant 0 : index
    %11 = vector.load %arg5[%c0_6, %c0_7, %c0_8, %c0_9] : memref<1x4x8x8xbf16, #tpu.memory_space<vmem>>, vector<1x4x8x8xbf16>
    %12 = vector.shape_cast %11 : vector<1x4x8x8xbf16> to vector<4x8x8xbf16>
    %13 = vector.shape_cast %10 : vector<4x8x8xbf16> to vector<1x4x8x8xbf16>
    tpu.vector_store %arg5[%c0_6, %c0_7, %c0_8, %c0_9], %13 {strides = array<i32>} : memref<1x4x8x8xbf16, #tpu.memory_space<vmem>>, vector<1x4x8x8xbf16>,
    return
  }
  func.func @transform_0(%arg0: i32, %arg1: i32) -> (i32, i32, i32) {
    %c0_i32 = arith.constant 0 : i32
    %c0_i32_0 = arith.constant 0 : i32
    return %arg0, %arg1, %c0_i32 : i32, i32, i32
  }
  func.func @transform_1(%arg0: i32, %arg1: i32) -> (i32, i32) {
    %c0_i32 = arith.constant 0 : i32
    %c0_i32_0 = arith.constant 0 : i32
    %c0_i32_1 = arith.constant 0 : i32
    return %c0_i32, %c0_i32_0 : i32, i32
  }
  func.func @transform_2(%arg0: i32, %arg1: i32) -> (i32, i32) {
    %c0_i32 = arith.constant 0 : i32
    %c0_i32_0 = arith.constant 0 : i32
    %c0_i32_1 = arith.constant 0 : i32
    return %c0_i32, %c0_i32_0 : i32, i32
  }
  func.func @transform_3(%arg0: i32, %arg1: i32) -> (i32, i32, i32, i32) {
    %c0_i32 = arith.constant 0 : i32
    %c0_i32_0 = arith.constant 0 : i32
    %c0_i32_1 = arith.constant 0 : i32
    return %arg0, %c0_i32, %arg1, %c0_i32_0 : i32, i32, i32, i32
  }
}

</mosaic_0001>

<bundles_post_ra>
// kernel: tpu_custom_call.1
= control target key start
LH: loop header
LB: loop body
LE: loop exit
PB: predicated region body
PF: predicated region fallthrough
CT: control target
= control target key end

     0   :  { %8 = vsyncpa [#allocation3], 0  ;;  %s967_s0 = inlined_call_operand.hbm [shape: f32[2,8,32], index: 0, kind: input, shape index: {}]   ;;  %s968_s1 = inlined_call_operand.hbm [shape: bf16[32,32], index: 1, kind: input, shape index: {}]   ;;  %s969_s2 = inlined_call_operand.vmem [shape: f32[1,32], index: 2, kind: input, shape index: {}]   ;;  %s970_s3 = inlined_call_operand.hbm [shape: bf16[2,4,8,8], index: 3, kind: output, shape index: {}]  }
   0x1   :  { %10 = vsyncpa [#allocation3 + $0x1], 0 }
   0x2   :  { %11 = vsyncpa [#allocation6], 0 }
   0x3   :  { %12 = vsyncpa [#allocation4], 0 }
   0x4   :  { %14 = vsyncpa [#allocation4 + $0x1], 0  ;;  %s792_s12 = smov 0   ;;  %s794_s13 = smov 0  }
   0x5   :  { %s796_s14 = smov 0   ;;  %s798_s15 = smov 0  }
   0x6   :  { %s800_s16 = smov 0   ;;  %s802_s17 = smov 0  }
   0x7 LB: > { %s503_s18 = sadd.s32 4294967295, %s760_s17   ;;  %p505_p0 = scmp.ge.s32.totalorder %s760_s17, 1  ;;  %s760_s17 = sphi %s802_s17, %s20_s17   ;;  %s756_s16 = sphi %s800_s16, %s981_s16   ;;  %s752_s15 = sphi %s798_s15, %s980_s15   ;;  %s748_s14 = sphi %s796_s14, %s979_s14   ;;  %s744_s13 = sphi %s794_s13, %s978_s13   ;;  %s740_s12 = sphi %s792_s12, %s977_s12  }
   0x8   : > { %p824_p1 = scmp.eq.s32.totalorder %s503_s18, 0  ;;  %p135_p2 = scmp.lt.s32.totalorder %s760_s17, 3 }
   0x9   : > { %s146_s22 = sshll.u32 %s968_s1, 4  ;;  %s762_s24 = smov [#allocation5]   ;;  %s147_s22 = int_to_ptr.hbm [resolvable:$true] %s146_s22 }
   0xa   : > { %p832_p3 = pnand %p505_p0, %p135_p2  ;;  %s148_s25 = sshll.u32 %s762_s24, 4  ;;  %s149_s25 = int_to_ptr.vmem [resolvable:$true] %s148_s25 }
   0xb   : > { %p507_p6 = scmp.ge.s32.totalorder %s760_s17, 2  ;;  %s763_s26 = smov 64  }
   0xc   : > { %p539_p4 = pneg %p832_p3  ;;  %s764_s27 = smov 4  }
   0xd   : > { %s504_s28 = sadd.s32 4294967294, %s760_s17   ;;  %s32_s29 = sadd.s32 1, %s756_s16 }
   0xe   : > { %p540_p5 = pnand %p539_p4, %p824_p1  ;;  %s41_s30 = sadd.s32 1, %s748_s14 }
   0xf   : > { %p34_p7 = scmp.ge.s32.totalorder %s32_s29, 2  ;;  %p48_p8 = scmp.ne.s32.totalorder %s748_s14, %s744_s13 }
  0x10   : > { %542 = dma.hbm_to_vmem [thread:$0]  (!%p540_p5), %s147_s22, 256, %s149_s25, [#allocation6], %s763_s26, %s763_s26, %s764_s27  }
  0x11   : > { %p49_p9 = scmp.eq.s32.totalorder %s760_s17, 0  ;;  %p54_p10 = scmp.ne.s32.totalorder %s744_s13, %s740_s12 }
  0x12   : > { %s983_s29 = smov (%p34_p7, %s32_s29), 0  ;;  %p122_p13 = scmp.eq.s32.totalorder %s503_s18, 1 }
  0x13   : > { %p851_p11 = por %p49_p9, %p48_p8  ;;  %p857_p12 = por %p824_p1, %p54_p10 }
  0x14   : > { %s36_s6 = ssub.s32 %s756_s16, %s983_s29  ;;  %p128_p2 = scmp.eq.s32.totalorder %s504_s28, 1 }
  0x15   : > { %p39_p0 = scmp.eq.s32.totalorder %s36_s6, 0  ;;  %p863_p4 = por %p122_p13, %p48_p8 }
  0x16   : > { %p552_p5 = scmp.lt.s32.totalorder %s760_s17, 2  ;;  %p871_p7 = por %p128_p2, %p54_p10 }
  0x17   : > { %s869_s8 = scalar_select %p39_p0, %s748_s14, %s41_s30  }
  0x18   : > { %s165_s10 = sand.u32 1, %s748_s14   ;;  %s509_s20 = sshll.u32 %s756_s16, 3 }
  0x19   : > { %s508_s11 = sshll.u32 %s165_s10, 3  ;;  %s174_s18 = scalar_lea.hbm %s967_s0, %s509_s20 }
  0x1a   : > { %s169_s24 = scalar_lea.vmem [#allocation2], %s508_s11  ;;  %s176_s26 = sshll.u32 %s174_s18, 4  ;;  %s177_s26 = int_to_ptr.hbm [resolvable:$true] %s176_s26 }
  0x1b   : > { %s178_s25 = sshll.u32 %s169_s24, 4  ;;  %p544_p8 = pnand %p552_p5, %p851_p11  ;;  %s179_s25 = int_to_ptr.vmem [resolvable:$true] %s178_s25 }
  0x1c   : > { %s166_s27 = scalar_lea.sflag [#allocation3], %s165_s10  ;;  %187 = sbr.rel (%p832_p3) target bundleno = 325 (0x145), region = 32 }
  0x1d   : > { %546 = dma.hbm_to_vmem [thread:$0]  (!%p544_p8), %s177_s26, 128, %s179_s25, %s166_s27  }
  0x1e   : > { %s885_s28 = sand.u32 (!%p832_p3), 1, %s744_s13  }
  0x1f   : > { %s511_s30 = sshll.u32 (!%p832_p3), %s885_s28, 3  ;;  %s190_s6 = scalar_lea.sflag (!%p832_p3), [#allocation3], %s885_s28 }
  0x20   : > { %s193_s11 = scalar_lea.vmem (!%p832_p3), [#allocation2], %s511_s30 }
  0x21   : > { %727 = dma.done.wait (%p857_p12), %s190_s6, 128  }
  0x22   : > { %729 = vsyncadd (%p857_p12), %s190_s6, 4294967168 }
  0x23   : > { %731 = dma.done.wait (%p824_p1), [#allocation6], 256  }
  0x24   : > { %733 = vsyncadd (%p824_p1), [#allocation6], 4294967040  ;;  %v529_v0 = vld [vmem:[#allocation5 + $0x8] sm:$0xff]  ;;  %v528_v1 = vld [vmem:[#allocation5] sm:$0xff]  ;;  %vm245_vm0 = vcmask 261120   ;;  %s765_s5 = smov 104  }
  0x25   : > { %255 = vmatpush.bf16.msra.mxu0 %v529_v0  ;;  %v223_v2 = vld [vmem:[%s193_s11] sm:$0xff]  ;;  %s766_s10 = smov 112   ;;  %s767_s19 = smov 120   ;;  %v768_v8 = vmov 1983009808   ;;  %vm273_vm1 = vcmask 1047556  }
  0x26   : > { %v224_v3 = vpack.c.bf16 %v223_v2, %v223_v2  ;;  %v613_v4 = vld [vmem:[%s969_s2] ss:$0 sm:$0xff]  ;;  %v278_v9 = vunpack.c.l.s4 %v768_v8  ;;  %v769_v17 = vmov 1934713408   ;;  %s530_s20 = sshll.u32 %s752_s15, 4  ;;  %s513_s21 = sshll.u32 %s885_s28, 4 }
  0x27   : > { %v302_v18 = vunpack.c.l.s4 %v769_v17  ;;  %s405_s24 = scalar_lea.hbm %s970_s3, %s530_s20  ;;  %vm387_vm2 = vcmask 60416   ;;  %s221_s15 = scalar_lea.vmem [#allocation7], %s513_s21 }
  0x28   : > { %v279_v15 = vunpack.c.0.s8 %v278_v9  ;;  %s406_s25 = sshll.u32 %s221_s15, 4  ;;  %s408_s26 = sshll.u32 %s405_s24, 4  ;;  %s407_s25 = int_to_ptr.vmem [resolvable:$true] %s406_s25  ;;  %s409_s26 = int_to_ptr.hbm [resolvable:$true] %s408_s26 }
  0x29   : > { %256 = vmatpush.bf16.msra.mxu0 %v528_v1  ;;  %v303_v23 = vunpack.c.0.s8 %v302_v18  ;;  %s393_s27 = scalar_lea.sflag [#allocation4], %s885_s28  ;;  %s688_s30 = sshra.s32 %s409_s26, 4  ;;  %s689_s30 = int_to_ptr.hbm [resolvable:$true] %s688_s30 }
  0x2a   : > { %s690_s6 = scalar_lea.hbm %s689_s30, 16  ;;  %s694_s4 = scalar_lea.hbm %s970_s3, 32 }
  0x2b   : > { %p691_p1 = scmp.ne.s32.totalorder %s689_s30, %s690_s6  ;;  %p695_p10 = scmp.lt.s32.totalorder %s689_s30, %s970_s3 }
  0x2c   : > { %522 = vmatmul.msk.bf16.vlgmr.msra.gmra.mxu0 %vm245_vm0, %v224_v3  ;;  %p696_p11 = scmp.lt.s32.totalorder %s694_s4, %s690_s6 }
  0x2d   : > { %p692_p3 = pnand %p691_p1, %p863_p4 }
  0x2e   : > { %p697_p12 = por %p696_p11, %p695_p10 }
  0x2f   : > { %p693_p9 = pneg %p692_p3 }
  0x31   : > { %p698_p13 = pnand %p697_p12, %p693_p9 }
  0xa9   : > { %v258_v5 = vpop.f32.mrf.mxu0 }
  0xaa   : > { %v259_v6 = vadd.f32 %v613_v4, %v258_v5 }
  0xac   : > { %269 = vrot.lane.b32.xlu1 %v259_v6, %s765_s5  ;;  %266 = vrot.lane.b32.xlu0 %v259_v6, %s766_s10  ;;  %v275_v13 = vrot.slane %v259_v6, 4 }
  0xb1   : > { %v260_v7 = vpop.f32.mrf.mxu0 }
  0xb4   : > { %263 = vrot.lane.b32.xlu0 %v259_v6, %s767_s19 }
 0x11e   : > { %v267_v10 = vpop.permute.xlu0 %266  ;;  %v270_v14 = vpop.permute.xlu1 %269 }
 0x11f   : > { %v272_v11 = vrot.slane %v267_v10, 4  ;;  %v276_v16 = vsel %vm273_vm1, %v267_v10, %v275_v13  ;;  %v285_v20 = vrot.slane %v270_v14, 4 }
 0x120   : > { %v284_v21 = vperm.slane %v276_v16, %v279_v15 }
 0x121   : > { %v274_v12 = vsel %vm273_vm1, %v272_v11, %v259_v6 }
 0x122   : > { %v280_v19 = vperm.slane %v274_v12, %v279_v15  ;;  %v311_v29 = vrot.slane %v284_v21, 4 }
 0x124   : > { %v299_v26 = vrot.slane %v280_v19, 4 }
 0x126   : > { %v264_v22 = vpop.permute.xlu0 %263 }
 0x127   : > { %v286_v24 = vsel %vm273_vm1, %v285_v20, %v264_v22  ;;  %v287_v25 = vrot.slane %v264_v22, 4 }
 0x128   : > { %v292_v27 = vperm.slane %v286_v24, %v279_v15 }
 0x129   : > { %v288_v28 = vsel %vm273_vm1, %v270_v14, %v287_v25 }
 0x12a   : > { %v296_v30 = vperm.slane %v288_v28, %v279_v15  ;;  %v297_v31 = vrot.slane %v292_v27, 4  ;;  %v300_v32 = vsel %vm273_vm1, %v292_v27, %v299_v26 }
 0x12b   : > { %v308_v33 = vperm.slane %v300_v32, %v303_v23 }
 0x12c   : > { %v298_v34 = vsel %vm273_vm1, %v297_v31, %v280_v19  ;;  %v309_v35 = vrot.slane %v296_v30, 4  ;;  %v312_v36 = vsel %vm273_vm1, %v296_v30, %v311_v29 }
 0x12d   : > { %v304_v37 = vperm.slane %v298_v34, %v303_v23  ;;  %v320_v38 = vperm.slane %v312_v36, %v303_v23  ;;  %v323_v39 = vrot.slane %v308_v33, 4 }
 0x12e   : > { %v310_v40 = vsel %vm273_vm1, %v309_v35, %v284_v21 }
 0x12f   : > { %v316_v41 = vperm.slane %v310_v40, %v303_v23  ;;  %v321_v42 = vrot.slane %v304_v37, 4  ;;  %v324_v43 = vsel %vm273_vm1, 0.0, %v323_v39  ;;  %v327_v44 = vrot.slane %v320_v38, 4 }
 0x130   : > { %v329_v45 = vsel %vm273_vm1, %v323_v39, %v304_v37  ;;  %v334_v46 = vrot.slane %v324_v43, 4 }
 0x131   : > { %v322_v47 = vsel %vm273_vm1, 0.0, %v321_v42  ;;  %v325_v48 = vrot.slane %v316_v41, 4  ;;  %v328_v49 = vsel %vm273_vm1, 0.0, %v327_v44  ;;  %v333_v50 = vperm.slane %v329_v45, %v279_v15 }
 0x132   : > { %v335_v51 = vsel %vm273_vm1, %v334_v46, %v322_v47  ;;  %v340_v52 = vsel %vm273_vm1, %v327_v44, %v316_v41  ;;  %v345_v53 = vrot.slane %v328_v49, 4 }
 0x133   : > { %v326_v54 = vsel %vm273_vm1, 0.0, %v325_v48  ;;  %v339_v55 = vperm.slane %v335_v51, %v279_v15  ;;  %v344_v56 = vperm.slane %v340_v52, %v279_v15  ;;  %v353_v57 = vrot.slane %v333_v50, 4 }
 0x134   : > { %v346_v58 = vsel %vm273_vm1, %v345_v53, %v326_v54 }
 0x135   : > { %v350_v59 = vperm.slane %v346_v58, %v279_v15  ;;  %v351_v60 = vrot.slane %v339_v55, 4  ;;  %v354_v61 = vsel %vm273_vm1, %v339_v55, %v353_v57  ;;  %v365_v62 = vrot.slane %v344_v56, 4 }
 0x136   : > { %v362_v63 = vperm.slane %v354_v61, %v303_v23 }
 0x137   : > { %v352_v0 = vsel %vm273_vm1, %v351_v60, %v333_v50  ;;  %v363_v1 = vrot.slane %v350_v59, 4  ;;  %v366_v2 = vsel %vm273_vm1, %v350_v59, %v365_v62 }
 0x138   : > { %v358_v3 = vperm.slane %v352_v0, %v303_v23  ;;  %v374_v4 = vperm.slane %v366_v2, %v303_v23  ;;  %v381_v5 = vrot.slane %v362_v63, 4 }
 0x139   : > { %v364_v6 = vsel %vm273_vm1, %v363_v1, %v344_v56 }
 0x13a   : > { %v370_v7 = vperm.slane %v364_v6, %v303_v23  ;;  %v377_v8 = vrot.slane %v358_v3, 4  ;;  %v379_v9 = vrot.slane %v374_v4, 4  ;;  %v382_v10 = vsel %vm273_vm1, %v374_v4, %v381_v5 }
 0x13b   : > { %v386_v11 = vpack.c.bf16 %v382_v10, %v382_v10 }
 0x13c   : > { %v375_v12 = vrot.slane %v370_v7, 4  ;;  %v378_v13 = vsel %vm273_vm1, %v370_v7, %v377_v8  ;;  %v380_v14 = vsel %vm273_vm1, %v379_v9, %v362_v63 }
 0x13d   : > { %v384_v15 = vpack.c.bf16 %v378_v13, %v378_v13  ;;  %v385_v16 = vpack.c.bf16 %v380_v14, %v380_v14  ;;  %391 = vst.msk [vmem:[%s221_s15 + $0xc] sm:$0xf] %vm387_vm2, %v386_v11 }
 0x13e   : > { %v376_v17 = vsel %vm273_vm1, %v375_v12, %v358_v3 }
 0x13f   : > { %v383_v18 = vpack.c.bf16 %v376_v17, %v376_v17  ;;  %389 = vst.msk [vmem:[%s221_s15 + $0x4] sm:$0xf] %vm387_vm2, %v384_v15 }
 0x140   : > { %390 = vst.msk [vmem:[%s221_s15 + $0x8] sm:$0xf] %vm387_vm2, %v385_v16 }
 0x141   : > { %388 = vst.msk [vmem:[%s221_s15] sm:$0xf] %vm387_vm2, %v383_v18 }
 0x142   : > { %701 = shalt.err (!%p698_p13)
}
 0x143   : > { %s770_s28 = smov 64   ;;  %s771_s19 = smov 4  }
 0x144   : > { %537 = dma.vmem_to_hbm [thread:$0]  (%p863_p4), %s407_s25, 256, %s409_s26, %s393_s27, %s770_s28, %s770_s28, %s771_s19  }
 0x145 PF: > { %s423_s20 = sand.u32 1, %s740_s12   ;;  %p548_p0 = pnand %p507_p6, %p871_p7 }
 0x146   : > { %s424_s21 = scalar_lea.sflag [#allocation4], %s423_s20 }
 0x147   : > { %p549_p2 = pneg %p548_p0 }
 0x149   : > { %735 = dma.done.wait (%p549_p2), %s424_s21, 256  }
 0x14a   : > { %737 = vsyncadd (%p549_p2), %s424_s21, 4294967040  ;;  %s20_s17 = sadd.s32 1, %s760_s17   ;;  %s977_s12 = smov %s744_s13 }
 0x14b   : > { %p17_p5 = scmp.ge.s32.totalorder %s20_s17, 4   ;;  %s978_s13 = smov %s748_s14 }
 0x14c   : > { %s979_s14 = smov %s869_s8  ;;  %s980_s15 = smov %s756_s16 }
 0x14d   : > { %s981_s16 = smov %s983_s29  ;;  %19 = sbr.rel (!%p17_p5) target bundleno = 7 (0x7), region = 81 }
 0x152   :  { %430 = vsyncpa [#allocation3], 1 }
 0x153   :  { %432 = vsyncpa [#allocation3 + $0x1], 1 }
 0x154   :  { %433 = vsyncpa [#allocation6], 1 }
 0x155   :  { %434 = vsyncpa [#allocation4], 1 }
 0x156   :  { %436 = vsyncpa [#allocation4 + $0x1], 1 }

</bundles_post_ra>
